<compile_context>
chip_gen: v7x
topology: tpu7x:2x2x1
jax: 0.10.0
libtpu: 0.0.40
codegen_flags: <defaults>
</compile_context>

<pallas_src>
import jax
import jax.numpy as jnp
from jax.experimental import pallas as pl
from jax.experimental.pallas import tpu as pltpu

# SELU constants (match torch.nn.SELU)
_SELU_ALPHA = 1.6732632423543772848170429916717
_SELU_SCALE = 1.0507009873554804934193349852946

_LANES = 128
_SUBLANES = 8


def _selu(x):
    return _SELU_SCALE * jnp.where(x > 0, x, _SELU_ALPHA * (jnp.exp(x) - 1.0))


def _mlp_kernel(x_ref, w1_ref, b1_ref, w2_ref, b2_ref, o_ref):
    # x: (TB, D), w1: (D, Hp), b1: (1, Hp), w2: (Hp, Op), b2: (1, Op)
    x = x_ref[...]
    h = jnp.dot(x, w1_ref[...], preferred_element_type=jnp.float32) + b1_ref[...]
    h = _selu(h)
    y = jnp.dot(h.astype(w2_ref.dtype), w2_ref[...],
                preferred_element_type=jnp.float32) + b2_ref[...]
    o_ref[...] = y.astype(o_ref.dtype)


def _round_up(n, m):
    return (n + m - 1) // m * m


def mlp_forward(x, w1, b1, w2, b2, *, batch_tile=256):
    """x: (B, D). w1: (D, H), b1: (1, H), w2: (H, O), b2: (1, O). Returns (B, O)."""
    B, D = x.shape
    H = w1.shape[1]
    O = w2.shape[1]
    dtype = x.dtype

    # Lane-pad hidden and output feature dims (exact under zero padding).
    Hp = _round_up(H, _LANES)
    Op = _round_up(O, _LANES)

    # Batch tiling: multiple of 8 sublanes; up to `batch_tile` rows per step.
    Bp = _round_up(B, _SUBLANES)
    if Bp >= batch_tile:
        TB = batch_tile
        Bp = _round_up(Bp, TB)
    else:
        TB = Bp
    n_tiles = Bp // TB

    xp = jnp.zeros((Bp, D), dtype).at[:B, :].set(x)
    w1p = jnp.zeros((D, Hp), dtype).at[:, :H].set(w1)
    b1p = jnp.zeros((1, Hp), dtype).at[:, :H].set(b1.reshape(1, H))
    w2p = jnp.zeros((Hp, Op), dtype).at[:H, :O].set(w2)
    b2p = jnp.zeros((1, Op), dtype).at[:, :O].set(b2.reshape(1, O))

    itemsize = jnp.dtype(dtype).itemsize
    flops = 2 * Bp * (D * Hp + Hp * Op)
    transcendentals = Bp * Hp  # exp in SELU
    bytes_accessed = (xp.size + w1p.size + b1p.size + w2p.size + b2p.size
                      + Bp * Op) * itemsize

    out_p = pl.pallas_call(
        _mlp_kernel,
        out_shape=jax.ShapeDtypeStruct((Bp, Op), dtype),
        grid_spec=pltpu.PrefetchScalarGridSpec(
            num_scalar_prefetch=0,
            grid=(n_tiles,),
            in_specs=[
                pl.BlockSpec((TB, D), lambda i: (i, 0)),   # x tile streams
                pl.BlockSpec((D, Hp), lambda i: (0, 0)),   # weights resident
                pl.BlockSpec((1, Hp), lambda i: (0, 0)),
                pl.BlockSpec((Hp, Op), lambda i: (0, 0)),
                pl.BlockSpec((1, Op), lambda i: (0, 0)),
            ],
            out_specs=pl.BlockSpec((TB, Op), lambda i: (i, 0)),
        ),
        compiler_params=pltpu.CompilerParams(
            dimension_semantics=("parallel",),
            vmem_limit_bytes=32 * 1024 * 1024,
        ),
        cost_estimate=pl.CostEstimate(
            flops=flops,
            transcendentals=transcendentals,
            bytes_accessed=bytes_accessed,
        ),
    )(xp, w1p, b1p, w2p, b2p)

    return out_p[:B, :O]


def init_mlp_params(key, dim, dim_hidden=16, dim_output=1, dtype=jnp.float32):
    """Deterministic init mimicking nn.Linear defaults.

    Weights are stored transposed relative to PyTorch: (in_features, out_features).
    """
    k1, k2, k3, k4 = jax.random.split(key, 4)
    bound1 = 1.0 / jnp.sqrt(dim)
    bound2 = 1.0 / jnp.sqrt(dim_hidden)
    w1 = jax.random.uniform(k1, (dim, dim_hidden), dtype, -bound1, bound1)
    b1 = jax.random.uniform(k2, (1, dim_hidden), dtype, -bound1, bound1)
    w2 = jax.random.uniform(k3, (dim_hidden, dim_output), dtype, -bound2, bound2)
    b2 = jax.random.uniform(k4, (1, dim_output), dtype, -bound2, bound2)
    return w1, b1, w2, b2


def _reference(x, w1, b1, w2, b2):
    h = x @ w1 + b1
    h = _SELU_SCALE * jnp.where(h > 0, h, _SELU_ALPHA * (jnp.exp(h) - 1.0))
    return h @ w2 + b2


if __name__ == "__main__":
    key = jax.random.PRNGKey(0)
    kx, kp, kx2 = jax.random.split(key, 3)

    batch, dim, dim_hidden, dim_output = 8, 32, 16, 1
    w1, b1, w2, b2 = init_mlp_params(kp, dim, dim_hidden, dim_output)

    # Small-batch check (single grid step).
    x = jax.random.normal(kx, (batch, dim), dtype=jnp.float32)
    out = jax.block_until_ready(mlp_forward(x, w1, b1, w2, b2))
    ref = _reference(x, w1, b1, w2, b2)
    assert out.shape == (batch, dim_output)
    assert jnp.allclose(out, ref, atol=1e-5, rtol=1e-5)

    # Larger batch to exercise the batch-tiled grid (2 tiles of 256 rows).
    x2 = jax.random.normal(kx2, (512, dim), dtype=jnp.float32)
    out2 = jax.block_until_ready(mlp_forward(x2, w1, b1, w2, b2))
    ref2 = _reference(x2, w1, b1, w2, b2)
    assert out2.shape == (512, dim_output)
    assert jnp.allclose(out2, ref2, atol=1e-5, rtol=1e-5)

    print("KERNEL_OK")
</pallas_src>

<mosaic_0001>
module attributes {stable_mosaic.version = 11 : i64} {
  func.func @_mlp_kernel(%arg0: i32, %arg1: memref<8x32xf32, #tpu.memory_space<vmem>>, %arg2: memref<32x128xf32, #tpu.memory_space<vmem>>, %arg3: memref<1x128xf32, #tpu.memory_space<vmem>>, %arg4: memref<128x128xf32, #tpu.memory_space<vmem>>, %arg5: memref<1x128xf32, #tpu.memory_space<vmem>>, %arg6: memref<8x128xf32, #tpu.memory_space<vmem>>) attributes {dimension_semantics = [#tpu.dimension_semantics<parallel>], iteration_bounds = array<i64: 1>, scalar_prefetch = 0 : i64, scratch_operands = 0 : i64, tpu.core_type = #tpu.core_type<tc>, window_params = [{transform_indices = @transform_0, window_bounds = array<i64: 8, 32>}, {pipeline_mode = #tpu.pipeline_mode<synchronous>, transform_indices = @transform_1, window_bounds = array<i64: 32, 128>}, {pipeline_mode = #tpu.pipeline_mode<synchronous>, transform_indices = @transform_2, window_bounds = array<i64: 1, 128>}, {pipeline_mode = #tpu.pipeline_mode<synchronous>, transform_indices = @transform_3, window_bounds = array<i64: 128, 128>}, {pipeline_mode = #tpu.pipeline_mode<synchronous>, transform_indices = @transform_4, window_bounds = array<i64: 1, 128>}, {transform_indices = @transform_5, window_bounds = array<i64: 8, 128>}]} {
    %c0 = arith.constant 0 : index
    %c0_0 = arith.constant 0 : index
    %0 = vector.load %arg1[%c0, %c0_0] : memref<8x32xf32, #tpu.memory_space<vmem>>, vector<8x32xf32>
    %c0_1 = arith.constant 0 : index
    %c0_2 = arith.constant 0 : index
    %1 = vector.load %arg2[%c0_1, %c0_2] : memref<32x128xf32, #tpu.memory_space<vmem>>, vector<32x128xf32>
    %cst = arith.constant dense<0.000000e+00> : vector<8x128xf32>
    %2 = tpu.matmul %0, %1, %cst {dimension_numbers = #tpu.dot_dimension_numbers<[1], [0], [0], [1], [0, 0, 1, 1], [], []>} : vector<8x32xf32>, vector<32x128xf32>, vector<8x128xf32> -> vector<8x128xf32>
    %c0_3 = arith.constant 0 : index
    %c0_4 = arith.constant 0 : index
    %3 = vector.load %arg3[%c0_3, %c0_4] : memref<1x128xf32, #tpu.memory_space<vmem>>, vector<1x128xf32>
    %4 = vector.broadcast %3 : vector<1x128xf32> to vector<8x128xf32>
    %5 = arith.addf %2, %4 : vector<8x128xf32>
    %cst_5 = arith.constant 0.000000e+00 : f32
    %6 = vector.broadcast %cst_5 : f32 to vector<8x128xf32>
    %7 = arith.cmpf ogt, %5, %6 : vector<8x128xf32>
    %8 = math.exp %5 : vector<8x128xf32>
    %cst_6 = arith.constant 1.000000e+00 : f32
    %9 = vector.broadcast %cst_6 : f32 to vector<8x128xf32>
    %10 = arith.subf %8, %9 : vector<8x128xf32>
    %cst_7 = arith.constant 1.67326319 : f32
    %11 = vector.broadcast %cst_7 : f32 to vector<8x128xf32>
    %12 = arith.mulf %11, %10 : vector<8x128xf32>
    %13 = arith.select %7, %5, %12 : vector<8x128xi1>, vector<8x128xf32>
    %cst_8 = arith.constant 1.05070102 : f32
    %14 = vector.broadcast %cst_8 : f32 to vector<8x128xf32>
    %15 = arith.mulf %14, %13 : vector<8x128xf32>
    %c0_9 = arith.constant 0 : index
    %c0_10 = arith.constant 0 : index
    %16 = vector.load %arg4[%c0_9, %c0_10] : memref<128x128xf32, #tpu.memory_space<vmem>>, vector<128x128xf32>
    %cst_11 = arith.constant dense<0.000000e+00> : vector<8x128xf32>
    %17 = tpu.matmul %15, %16, %cst_11 {dimension_numbers = #tpu.dot_dimension_numbers<[1], [0], [0], [1], [0, 0, 1, 1], [], []>} : vector<8x128xf32>, vector<128x128xf32>, vector<8x128xf32> -> vector<8x128xf32>
    %c0_12 = arith.constant 0 : index
    %c0_13 = arith.constant 0 : index
    %18 = vector.load %arg5[%c0_12, %c0_13] : memref<1x128xf32, #tpu.memory_space<vmem>>, vector<1x128xf32>
    %19 = vector.broadcast %18 : vector<1x128xf32> to vector<8x128xf32>
    %20 = arith.addf %17, %19 : vector<8x128xf32>
    %c0_14 = arith.constant 0 : index
    %c0_15 = arith.constant 0 : index
    %21 = vector.load %arg6[%c0_14, %c0_15] : memref<8x128xf32, #tpu.memory_space<vmem>>, vector<8x128xf32>
    tpu.vector_store %arg6[%c0_14, %c0_15], %20 {strides = array<i32>} : memref<8x128xf32, #tpu.memory_space<vmem>>, vector<8x128xf32>,
    return
  }
  func.func @transform_0(%arg0: i32) -> (i32, i32) {
    %c0_i32 = arith.constant 0 : i32
    %c0_i32_0 = arith.constant 0 : i32
    return %arg0, %c0_i32 : i32, i32
  }
  func.func @transform_1(%arg0: i32) -> (i32, i32) {
    %c0_i32 = arith.constant 0 : i32
    %c0_i32_0 = arith.constant 0 : i32
    %c0_i32_1 = arith.constant 0 : i32
    return %c0_i32, %c0_i32_0 : i32, i32
  }
  func.func @transform_2(%arg0: i32) -> (i32, i32) {
    %c0_i32 = arith.constant 0 : i32
    %c0_i32_0 = arith.constant 0 : i32
    %c0_i32_1 = arith.constant 0 : i32
    return %c0_i32, %c0_i32_0 : i32, i32
  }
  func.func @transform_3(%arg0: i32) -> (i32, i32) {
    %c0_i32 = arith.constant 0 : i32
    %c0_i32_0 = arith.constant 0 : i32
    %c0_i32_1 = arith.constant 0 : i32
    return %c0_i32, %c0_i32_0 : i32, i32
  }
  func.func @transform_4(%arg0: i32) -> (i32, i32) {
    %c0_i32 = arith.constant 0 : i32
    %c0_i32_0 = arith.constant 0 : i32
    %c0_i32_1 = arith.constant 0 : i32
    return %c0_i32, %c0_i32_0 : i32, i32
  }
  func.func @transform_5(%arg0: i32) -> (i32, i32) {
    %c0_i32 = arith.constant 0 : i32
    %c0_i32_0 = arith.constant 0 : i32
    return %arg0, %c0_i32 : i32, i32
  }
}

</mosaic_0001>

<bundles_post_ra>
// kernel: tpu_custom_call.1
= control target key start
LH: loop header
LB: loop body
LE: loop exit
PB: predicated region body
PF: predicated region fallthrough
CT: control target
= control target key end

     0   :  { %10 = vsyncpa [#allocation3], 0  ;;  %s569_s0 = inlined_call_operand.hbm [shape: f32[8,32], index: 0, kind: input, shape index: {}]   ;;  %s570_s1 = inlined_call_operand.hbm [shape: f32[32,128], index: 1, kind: input, shape index: {}]   ;;  %s571_s2 = inlined_call_operand.vmem [shape: f32[1,128], index: 2, kind: input, shape index: {}]   ;;  %s572_s3 = inlined_call_operand.hbm [shape: f32[128,128], index: 3, kind: input, shape index: {}]   ;;  %s573_s4 = inlined_call_operand.vmem [shape: f32[1,128], index: 4, kind: input, shape index: {}]   ;;  %s574_s5 = inlined_call_operand.hbm [shape: f32[8,128], index: 5, kind: output, shape index: {}]  }
   0x1   :  { %11 = vsyncpa [#allocation6], 0 }
   0x2   :  { %12 = vsyncpa [#allocation4], 0  ;;  %s470_s18 = smov [#allocation5]   ;;  %s376_s22 = scalar_lea.hbm %s570_s1, 512 }
   0x3   :  { %s28_s19 = sshll.u32 %s470_s18, 4  ;;  %p377_p0 = scmp.ne.s32.totalorder %s570_s1, %s376_s22  ;;  %s29_s19 = int_to_ptr.vmem [resolvable:$true] %s28_s19 }
   0x4   :  { %p380_p1 = scmp.lt.u32.totalorder %s376_s22, %s570_s1 }
   0x6   :  { %p382_p2 = pnand %p380_p1, %p377_p0 }
   0x8   :  { %385 = shalt.err (!%p382_p2)
}
   0x9   :  { %s386_s27 = scalar_lea.vmem %s29_s19, 512  ;;  %p391_p4 = scmp.lt.s32.totalorder %s29_s19, %s29_s19 }
   0xa   :  { %p387_p3 = scmp.ne.s32.totalorder %s29_s19, %s386_s27  ;;  %p392_p5 = scmp.lt.s32.totalorder %s386_s27, %s386_s27 }
   0xc   :  { %p393_p6 = por %p392_p5, %p391_p4 }
   0xe   :  { %p394_p7 = pnand %p393_p6, %p387_p3 }
  0x10   :  { %397 = shalt.err (!%p394_p7)
}
  0x11   :  { %s471_s28 = smov 128   ;;  %s472_s29 = smov 8  }
  0x12   :  { %34 = dma.hbm_to_vmem [thread:$0]  %s570_s1, 512, %s29_s19, [#allocation6], %s471_s28, %s471_s28, %s472_s29  }
  0x13   :  { %s473_s7 = smov [#allocation2]   ;;  %s474_s9 = smov [#allocation7]  }
  0x14   :  { %s19_s8 = sshll.u32 %s473_s7, 4  ;;  %s42_s10 = sshll.u32 %s474_s9, 4  ;;  %s20_s8 = int_to_ptr.vmem [resolvable:$true] %s19_s8  ;;  %s43_s10 = int_to_ptr.vmem [resolvable:$true] %s42_s10 }
  0x15   :  { %s398_s13 = scalar_lea.hbm %s569_s0, 128 }
  0x16   :  { %p399_p8 = scmp.ne.s32.totalorder %s569_s0, %s398_s13  ;;  %p402_p9 = scmp.lt.u32.totalorder %s398_s13, %s569_s0 }
  0x18   :  { %p404_p10 = pnand %p402_p9, %p399_p8 }
  0x1a   :  { %407 = shalt.err (!%p404_p10)
}
  0x1b   :  { %s408_s1 = scalar_lea.vmem %s20_s8, 128  ;;  %p413_p12 = scmp.lt.s32.totalorder %s20_s8, %s20_s8 }
  0x1c   :  { %p409_p11 = scmp.ne.s32.totalorder %s20_s8, %s408_s1  ;;  %p414_p13 = scmp.lt.s32.totalorder %s408_s1, %s408_s1 }
  0x1e   :  { %p415_p0 = por %p414_p13, %p413_p12 }
  0x20   :  { %p416_p1 = pnand %p415_p0, %p409_p11 }
  0x22   :  { %419 = shalt.err (!%p416_p1)
}
  0x23   :  { %22 = dma.hbm_to_vmem [thread:$0]  %s569_s0, 128, %s20_s8, [#allocation3]  }
  0x24   :  { %s420_s22 = scalar_lea.hbm %s572_s3, 2048 }
  0x25   :  { %p421_p2 = scmp.ne.s32.totalorder %s572_s3, %s420_s22  ;;  %p424_p3 = scmp.lt.u32.totalorder %s420_s22, %s572_s3 }
  0x27   :  { %p426_p4 = pnand %p424_p3, %p421_p2 }
  0x29   :  { %429 = shalt.err (!%p426_p4)
}
  0x2a   :  { %s430_s27 = scalar_lea.vmem %s43_s10, 2048  ;;  %p435_p6 = scmp.lt.s32.totalorder %s43_s10, %s43_s10 }
  0x2b   :  { %p431_p5 = scmp.ne.s32.totalorder %s43_s10, %s430_s27  ;;  %p436_p7 = scmp.lt.s32.totalorder %s430_s27, %s430_s27 }
  0x2d   :  { %p437_p8 = por %p436_p7, %p435_p6 }
  0x2f   :  { %p438_p9 = pnand %p437_p8, %p431_p5 }
  0x31   :  { %441 = shalt.err (!%p438_p9)
}
  0x32   :  { %48 = dma.hbm_to_vmem [thread:$0]  %s572_s3, 2048, %s43_s10, [#allocation6], %s471_s28, %s471_s28, %s472_s29  }
  0x33   :  { %464 = dma.done.wait [#allocation3], 128  }
  0x34   :  { %465 = vsyncadd [#allocation3], 4294967168 }
  0x35   :  { %466 = dma.done.wait [#allocation6], 2560  }
  0x36   :  { %467 = vsyncadd [#allocation6], 4294964736  ;;  %v475_v0 = vmov 0.0|0.0   ;;  %vm476_vm0 = vmmov 0   ;;  %v477_v1 = vmov 0.0   ;;  %v61_v2 = vld [vmem:[#allocation5] sm:$0xff] }
  0x37   :  { %335 = vmatprep.subr.bf16.mxu0 %v475_v0  ;;  %297 = vmatprep.mubr.msk.f32.mxu0 %vm476_vm0, %v477_v1  ;;  %v62_v3 = vld [vmem:[#allocation5 + $0x8] sm:$0xff]  ;;  %v63_v4 = vld [vmem:[#allocation5 + $0x10] sm:$0xff]  ;;  %v64_v6 = vld [vmem:[#allocation5 + $0x18] sm:$0xff]  ;;  %vm72_vm1 = vcmask 261120   ;;  %s478_s7 = smov [#allocation8]  }
  0x38   :  { %341 = vmatprep.subr.bf16.mxu1 %v475_v0  ;;  %332 = vmatprep.mubr.msk.f32.mxu1 %vm476_vm0, %v477_v1  ;;  %v336_v5 = vpack.c.bf16 %v62_v3, %v61_v2  ;;  %v153_v7 = vld [vmem:[#allocation7] sm:$0xff]  ;;  %v154_v8 = vld [vmem:[#allocation7 + $0x8] sm:$0xff]  ;;  %v155_v9 = vld [vmem:[#allocation7 + $0x10] sm:$0xff]  ;;  %v339_v11 = vpack.c.bf16 %v64_v6, %v63_v4  ;;  %s253_s8 = sshll.u32 %s478_s7, 4  ;;  %s254_s8 = int_to_ptr.vmem [resolvable:$true] %s253_s8 }
  0x39   :  { %v156_v10 = vld [vmem:[#allocation7 + $0x18] sm:$0xff]  ;;  %v342_v12 = vpack.c.bf16 %v154_v8, %v153_v7  ;;  %v157_v15 = vld [vmem:[#allocation7 + $0x20] sm:$0xff]  ;;  %v158_v16 = vld [vmem:[#allocation7 + $0x28] sm:$0xff]  ;;  %p447_p11 = scmp.lt.s32.totalorder %s254_s8, %s254_s8 }
  0x3a   :  { %337 = vmatpush3.bf16.msra.mxu0 %v336_v5  ;;  %v345_v13 = vpack.c.bf16 %v156_v10, %v155_v9  ;;  %v60_v14 = vld [vmem:[#allocation2] sm:$0xff]  ;;  %v348_v17 = vpack.c.bf16 %v158_v16, %v157_v15  ;;  %v159_v18 = vld [vmem:[#allocation7 + $0x30] sm:$0xff]  ;;  %v161_v21 = vld [vmem:[#allocation7 + $0x40] sm:$0xff] }
  0x3b   :  { %338 = vmatprep.subr.bf16.mxu0 %v475_v0  ;;  %343 = vmatpush3.bf16.msra.mxu1 %v342_v12  ;;  %v160_v19 = vld [vmem:[#allocation7 + $0x38] sm:$0xff]  ;;  %v162_v22 = vld [vmem:[#allocation7 + $0x48] sm:$0xff]  ;;  %v163_v24 = vld [vmem:[#allocation7 + $0x50] sm:$0xff] }
  0x3c   :  { %344 = vmatprep.subr.bf16.mxu1 %v475_v0  ;;  %v351_v20 = vpack.c.bf16 %v160_v19, %v159_v18  ;;  %v354_v23 = vpack.c.bf16 %v162_v22, %v161_v21  ;;  %v164_v25 = vld [vmem:[#allocation7 + $0x58] sm:$0xff]  ;;  %v165_v27 = vld [vmem:[#allocation7 + $0x60] sm:$0xff]  ;;  %v166_v28 = vld [vmem:[#allocation7 + $0x68] sm:$0xff] }
  0x3d   :  { %v357_v26 = vpack.c.bf16 %v164_v25, %v163_v24  ;;  %v360_v29 = vpack.c.bf16 %v166_v28, %v165_v27  ;;  %v167_v30 = vld [vmem:[#allocation7 + $0x70] sm:$0xff]  ;;  %v168_v31 = vld [vmem:[#allocation7 + $0x78] sm:$0xff] }
  0x3e   :  { %340 = vmatpush3.bf16.msra.mxu0 %v339_v11  ;;  %v363_v32 = vpack.c.bf16 %v168_v31, %v167_v30  ;;  %v263_v33 = vld [vmem:[%s571_s2] ss:$0 sm:$0xff]  ;;  %s442_s2 = scalar_lea.vmem %s254_s8, 128 }
  0x3f   :  { %346 = vmatpush3.bf16.msra.mxu1 %v345_v13  ;;  %v266_v43 = vld [vmem:[%s573_s4] ss:$0 sm:$0xff]  ;;  %p443_p10 = scmp.ne.s32.totalorder %s254_s8, %s442_s2  ;;  %p448_p12 = scmp.lt.s32.totalorder %s442_s2, %s442_s2 }
  0x40   :  { %347 = vmatprep.subr.bf16.mxu1 %v475_v0 }
  0x41   :  { %298 = vmatmul.mubr.msk.f32.vlgmr.msra.gmra.mrb[0].mxu0 %vm72_vm1, %v60_v14  ;;  %p449_p13 = por %p448_p12, %p447_p11 }
  0x43   :  { %349 = vmatpush3.bf16.msra.mxu1 %v348_v17  ;;  %p450_p0 = pnand %p449_p13, %p443_p10 }
  0x44   :  { %350 = vmatprep.subr.bf16.mxu1 %v475_v0 }
  0x47   :  { %352 = vmatpush3.bf16.msra.mxu1 %v351_v20 }
  0x48   :  { %353 = vmatprep.subr.bf16.mxu1 %v475_v0 }
  0x4b   :  { %355 = vmatpush3.bf16.msra.mxu1 %v354_v23 }
  0x4c   :  { %356 = vmatprep.subr.bf16.mxu1 %v475_v0 }
  0x4f   :  { %358 = vmatpush3.bf16.msra.mxu1 %v357_v26 }
  0x50   :  { %359 = vmatprep.subr.bf16.mxu1 %v475_v0 }
  0x53   :  { %361 = vmatpush3.bf16.msra.mxu1 %v360_v29 }
  0x54   :  { %362 = vmatprep.subr.bf16.mxu1 %v475_v0 }
  0x57   :  { %364 = vmatpush3.bf16.msra.mxu1 %v363_v32 }
 0x114   :  { %v142_v34 = vpop.f32.mrb[0].mxu0 }
 0x115   :  { %v143_v35 = vadd.f32 %v263_v33, %v142_v34  ;;  %v299_v36 = vpop.f32.mrb[1].mxu0 }
 0x117   :  { %v147_v37 = vmul.f32 1.442695, %v143_v35  ;;  %vm146_vm2 = vcmp.gt.f32.partialorder %v143_v35, 0.0 }
 0x119   :  { %374 = vpow2.f32 %v147_v37 }
 0x123   :  { %v375_v38 = vpop.eup %374 }
 0x124   :  { %v265_v39 = vadd.f32 -1.0, %v375_v38 }
 0x126   :  { %v150_v40 = vmul.f32 1.6732632, %v265_v39 }
 0x128   :  { %v151_v41 = vsel %vm146_vm2, %v143_v35, %v150_v40 }
 0x129   :  { %v152_v42 = vmul.f32 1.050701, %v151_v41 }
 0x12b   :  { %333 = vmatmul.mubr.f32.vlgmr.msra.gmra.mrb[0].mxu1 %v152_v42 }
 0x1fe   :  { %v242_v44 = vpop.f32.mrb[0].mxu1 }
 0x1ff   :  { %v243_v45 = vadd.f32 %v266_v43, %v242_v44  ;;  %v334_v46 = vpop.f32.mrb[1].mxu1 }
 0x201   :  { %246 = vst [vmem:[#allocation8] sm:$0xff] %v243_v45 }
 0x202   :  { %453 = shalt.err (!%p450_p0)
}
 0x203   :  { %s454_s11 = scalar_lea.hbm %s574_s5, 128 }
 0x204   :  { %p455_p1 = scmp.ne.s32.totalorder %s574_s5, %s454_s11  ;;  %p458_p2 = scmp.lt.u32.totalorder %s454_s11, %s574_s5 }
 0x206   :  { %p460_p3 = pnand %p458_p2, %p455_p1 }
 0x208   :  { %463 = shalt.err (!%p460_p3)
}
 0x209   :  { %256 = dma.vmem_to_hbm [thread:$0]  %s254_s8, 128, %s574_s5, [#allocation4]  }
 0x20a   :  { %468 = dma.done.wait [#allocation4], 128  }
 0x20b   :  { %469 = vsyncadd [#allocation4], 4294967168 }
 0x20c   :  { %260 = vsyncpa [#allocation3], 1 }
 0x20d   :  { %261 = vsyncpa [#allocation6], 1 }
 0x20e   :  { %262 = vsyncpa [#allocation4], 1 }

</bundles_post_ra>
